<compile_context>
chip_gen: v7x
topology: tpu7x:2x2x1
jax: 0.10.0
libtpu: 0.0.40
codegen_flags: <defaults>
</compile_context>

<pallas_src>
import numpy as np

import jax
import jax.numpy as jnp
from jax.experimental import pallas as pl
from jax.experimental.pallas import tpu as pltpu

NUM_EMBEDDINGS = 100
EMB_PAD = 128  # embedding rows padded once to a clean MXU contraction dim
TILE_N = 256   # row tile for the large-N path (keeps one-hot + out un-spilled)

LAYER_TYPES = ["Linear", "Conv", "Pooling"]  # mirrors the module's layer_types list


def layer_to_index(layer_name: str) -> int:
    return LAYER_TYPES.index(layer_name.split("-")[0])


def _round_up(x: int, m: int) -> int:
    return ((x + m - 1) // m) * m


def _gather_kernel(idx_ref, table_ref, out_ref):
    """Vectorized embedding gather via one-hot matmul on the MXU.

    idx_ref   : VMEM i32[N, 1]       (row indices for this block)
    table_ref : VMEM f32[128, D]     (row-padded embedding table, resident)
    out_ref   : VMEM f32[N, D]       (one gathered row per index)
    """
    n = out_ref.shape[0]
    emb = table_ref.shape[0]
    # one_hot[i, j] = 1.0 iff j == idx[i]
    col_ids = jax.lax.broadcasted_iota(jnp.int32, (n, emb), 1)
    one_hot = (col_ids == idx_ref[...]).astype(table_ref.dtype)
    # Single (N, 128) x (128, D) MXU pass replaces N serialized 1-row copies.
    out_ref[...] = jnp.dot(
        one_hot, table_ref[...], preferred_element_type=jnp.float32
    ).astype(out_ref.dtype)


def _cost(n_rows: int, d: int) -> pl.CostEstimate:
    return pl.CostEstimate(
        flops=2 * n_rows * EMB_PAD * d,
        transcendentals=0,
        bytes_accessed=EMB_PAD * d * 4 + n_rows * d * 4 + n_rows * 4,
    )


def embedding_bag_lookup(indices_np: np.ndarray, table_padded: jax.Array) -> jax.Array:
    """indices_np: host int array (n,). table_padded: (128, d) pre-padded table."""
    n = int(indices_np.shape[0])
    d = int(table_padded.shape[1])

    if n <= TILE_N:
        # Small-N path: gridless, full-array blocks, no padding, no trailing slice.
        idx = jnp.asarray(np.asarray(indices_np, dtype=np.int32).reshape(n, 1))
        return pl.pallas_call(
            _gather_kernel,
            out_shape=jax.ShapeDtypeStruct((n, d), table_padded.dtype),
            in_specs=[
                pl.BlockSpec((n, 1), lambda: (0, 0)),
                pl.BlockSpec((EMB_PAD, d), lambda: (0, 0)),
            ],
            out_specs=pl.BlockSpec((n, d), lambda: (0, 0)),
            cost_estimate=_cost(n, d),
        )(idx, table_padded)

    # Large-N path: tile N at TILE_N rows, table resident across the grid.
    n_pad = _round_up(n, TILE_N)
    idx_host = np.zeros((n_pad, 1), dtype=np.int32)
    idx_host[:n, 0] = np.asarray(indices_np, dtype=np.int32)
    idx = jnp.asarray(idx_host)

    out_p = pl.pallas_call(
        _gather_kernel,
        out_shape=jax.ShapeDtypeStruct((n_pad, d), table_padded.dtype),
        grid_spec=pl.GridSpec(
            grid=(n_pad // TILE_N,),
            in_specs=[
                pl.BlockSpec((TILE_N, 1), lambda i: (i, 0)),
                pl.BlockSpec((EMB_PAD, d), lambda i: (0, 0)),  # resident table
            ],
            out_specs=pl.BlockSpec((TILE_N, d), lambda i: (i, 0)),
        ),
        compiler_params=pltpu.CompilerParams(
            dimension_semantics=("parallel",)  # v7x: shard gather over both TCs
        ),
        cost_estimate=_cost(n_pad, d),
    )(idx, table_padded)

    return out_p[:n]


class LayerEmbedding:
    """JAX/Pallas port of the PyTorch LayerEmbedding module (forward only)."""

    def __init__(self, embedding_dim: int, key: jax.Array):
        # Deterministic init of nn.EmbeddingBag(100, embedding_dim).weight ~ N(0, 1)
        self.embedding_dim = embedding_dim
        self.weight = jax.random.normal(
            key, (NUM_EMBEDDINGS, embedding_dim), dtype=jnp.float32
        )
        # Hoisted one-time row padding 100 -> 128 (review item 1): removes the
        # per-call zeros + dynamic_update_slice table round trip.
        self.weight_padded = (
            jnp.zeros((EMB_PAD, embedding_dim), dtype=jnp.float32)
            .at[:NUM_EMBEDDINGS, :]
            .set(self.weight)
        )

    def __call__(self, layer_names):
        indices = np.asarray(
            [layer_to_index(name) for name in layer_names], dtype=np.int32
        )
        return embedding_bag_lookup(indices, self.weight_padded)


if __name__ == "__main__":
    embedding_dim = 32
    layer_names = ["Linear-256-512", "Conv-32-64-3", "Pooling-2"]

    key = jax.random.PRNGKey(0)
    model = LayerEmbedding(embedding_dim, key)

    # --- small-N (gridless) path, matches the module's example input ---
    out = model(layer_names)
    out = jax.block_until_ready(out)

    ref_idx = jnp.asarray([layer_to_index(n) for n in layer_names], dtype=jnp.int32)
    ref = jnp.take(model.weight, ref_idx, axis=0)
    assert out.shape == (len(layer_names), embedding_dim)
    assert jnp.allclose(out, ref), "Pallas embedding gather mismatch (small path)"

    # --- large-N (tiled, parallel-grid) path ---
    big_names = [layer_names[i % 3] for i in range(300)]
    out_big = jax.block_until_ready(model(big_names))
    ref_big_idx = jnp.asarray(
        [layer_to_index(n) for n in big_names], dtype=jnp.int32
    )
    ref_big = jnp.take(model.weight, ref_big_idx, axis=0)
    assert out_big.shape == (len(big_names), embedding_dim)
    assert jnp.allclose(out_big, ref_big), "Pallas embedding gather mismatch (tiled path)"

    print("KERNEL_OK")
</pallas_src>

<mosaic_0001>
module attributes {stable_mosaic.version = 11 : i64} {
  func.func @_gather_kernel(%arg0: memref<3x1xi32, #tpu.memory_space<vmem>>, %arg1: memref<128x32xf32, #tpu.memory_space<vmem>>, %arg2: memref<3x32xf32, #tpu.memory_space<vmem>>) attributes {dimension_semantics = [], scalar_prefetch = 0 : i64, scratch_operands = 0 : i64, tpu.core_type = #tpu.core_type<tc>} {
    %0 = tpu.iota {dimensions = array<i32: 1>} : vector<3x128xi32>
    %c0 = arith.constant 0 : index
    %c0_0 = arith.constant 0 : index
    %1 = vector.load %arg0[%c0, %c0_0] : memref<3x1xi32, #tpu.memory_space<vmem>>, vector<3x1xi32>
    %2 = vector.broadcast %1 : vector<3x1xi32> to vector<3x128xi32>
    %3 = arith.cmpi eq, %0, %2 : vector<3x128xi32>
    %4 = arith.extui %3 : vector<3x128xi1> to vector<3x128xi32>
    %5 = arith.sitofp %4 : vector<3x128xi32> to vector<3x128xf32>
    %c0_1 = arith.constant 0 : index
    %c0_2 = arith.constant 0 : index
    %6 = vector.load %arg1[%c0_1, %c0_2] : memref<128x32xf32, #tpu.memory_space<vmem>>, vector<128x32xf32>
    %cst = arith.constant dense<0.000000e+00> : vector<3x32xf32>
    %7 = tpu.matmul %5, %6, %cst {dimension_numbers = #tpu.dot_dimension_numbers<[1], [0], [0], [1], [0, 0, 1, 1], [], []>} : vector<3x128xf32>, vector<128x32xf32>, vector<3x32xf32> -> vector<3x32xf32>
    %c0_3 = arith.constant 0 : index
    %c0_4 = arith.constant 0 : index
    %8 = vector.load %arg2[%c0_3, %c0_4] : memref<3x32xf32, #tpu.memory_space<vmem>>, vector<3x32xf32>
    tpu.vector_store %arg2[%c0_3, %c0_4], %7 {strides = array<i32>} : memref<3x32xf32, #tpu.memory_space<vmem>>, vector<3x32xf32>,
    return
  }
}

</mosaic_0001>

<bundles_post_ra>
// kernel: tpu_custom_call.1
= control target key start
LH: loop header
LB: loop body
LE: loop exit
PB: predicated region body
PF: predicated region fallthrough
CT: control target
= control target key end

     0   :  { %v232_v3 = vmov 0   ;;  %v233_v4 = vmov 0.0|0.0   ;;  %vm234_vm0 = vmmov 0   ;;  %v235_v8 = vmov 0.0   ;;  %s316_s0 = inlined_call_operand.vmem [shape: s32[3,1], index: 0, kind: input, shape index: {}]   ;;  %s317_s1 = inlined_call_operand.vmem [shape: f32[128,32], index: 1, kind: input, shape index: {}]   ;;  %s318_s2 = inlined_call_operand.hbm [shape: f32[3,32], index: 2, kind: output, shape index: {}]  }
   0x1   :  { %v14_v0 = vld [vmem:[%s316_s0] sm:$0x7]  ;;  %v22_v2 = vld [vmem:[%s317_s1 + $0x8] sm:$0xff]  ;;  %207 = vset.pattern.permute.xlu0 %v232_v3  ;;  %177 = vmatprep.subr.bf16.mxu0 %v233_v4  ;;  %v23_v6 = vld [vmem:[%s317_s1 + $0x10] sm:$0xff] }
   0x2   :  { %v21_v1 = vld [vmem:[%s317_s1] sm:$0xff]  ;;  %v24_v7 = vld [vmem:[%s317_s1 + $0x18] sm:$0xff]  ;;  %16 = vperm.xlu0 %207, %v14_v0   ;;  %174 = vmatprep.mubr.msk.f32.mxu0 %vm234_vm0, %v235_v8  ;;  %v26_v11 = vld [vmem:[%s317_s1 + $0x28] sm:$0xff] }
   0x3   :  { %v178_v5 = vpack.c.bf16 %v22_v2, %v21_v1  ;;  %v181_v9 = vpack.c.bf16 %v24_v7, %v23_v6  ;;  %v25_v10 = vld [vmem:[%s317_s1 + $0x20] sm:$0xff] }
   0x5   :  { %179 = vmatpush3.bf16.msra.mxu0 %v178_v5 }
   0x6   :  { %180 = vmatprep.subr.bf16.mxu0 %v233_v4 }
   0x7   :  { %7 = vsyncpa [#allocation3], 0  ;;  %v184_v12 = vpack.c.bf16 %v26_v11, %v25_v10  ;;  %v27_v13 = vld [vmem:[%s317_s1 + $0x30] sm:$0xff]  ;;  %v28_v14 = vld [vmem:[%s317_s1 + $0x38] sm:$0xff]  ;;  %v12_v28 = vlaneseq  ;;  %v236_v31 = vmov 1.0   ;;  %s237_s14 = smov [#allocation2]  }
   0x8   :  { %v187_v15 = vpack.c.bf16 %v28_v14, %v27_v13  ;;  %v29_v16 = vld [vmem:[%s317_s1 + $0x40] sm:$0xff]  ;;  %v30_v17 = vld [vmem:[%s317_s1 + $0x48] sm:$0xff]  ;;  %v31_v19 = vld [vmem:[%s317_s1 + $0x50] sm:$0xff]  ;;  %s115_s15 = sshll.u32 %s237_s14, 4  ;;  %vm107_vm2 = vcmask 256000   ;;  %s116_s15 = int_to_ptr.vmem [resolvable:$true] %s115_s15 }
   0x9   :  { %182 = vmatpush3.bf16.msra.mxu0 %v181_v9  ;;  %v190_v18 = vpack.c.bf16 %v30_v17, %v29_v16  ;;  %v32_v20 = vld [vmem:[%s317_s1 + $0x58] sm:$0xff]  ;;  %v33_v22 = vld [vmem:[%s317_s1 + $0x60] sm:$0xff]  ;;  %v34_v23 = vld [vmem:[%s317_s1 + $0x68] sm:$0xff]  ;;  %v13_v29 = vand.u32 127, %v12_v28  ;;  %s208_s16 = scalar_lea.vmem %s116_s15, 64  ;;  %p213_p1 = scmp.lt.s32.totalorder %s116_s15, %s116_s15 }
   0xa   :  { %183 = vmatprep.subr.bf16.mxu0 %v233_v4  ;;  %v193_v21 = vpack.c.bf16 %v32_v20, %v31_v19  ;;  %v196_v24 = vpack.c.bf16 %v34_v23, %v33_v22  ;;  %v35_v25 = vld [vmem:[%s317_s1 + $0x70] sm:$0xff]  ;;  %v36_v26 = vld [vmem:[%s317_s1 + $0x78] sm:$0xff]  ;;  %p209_p0 = scmp.ne.s32.totalorder %s116_s15, %s208_s16  ;;  %p214_p2 = scmp.lt.s32.totalorder %s208_s16, %s208_s16 }
   0xb   :  { %v199_v27 = vpack.c.bf16 %v36_v26, %v35_v25 }
   0xc   :  { %p215_p3 = por %p214_p2, %p213_p1 }
   0xd   :  { %185 = vmatpush3.bf16.msra.mxu0 %v184_v12 }
   0xe   :  { %186 = vmatprep.subr.bf16.mxu0 %v233_v4  ;;  %p216_p4 = pnand %p215_p3, %p209_p0 }
  0x11   :  { %188 = vmatpush3.bf16.msra.mxu0 %v187_v15 }
  0x12   :  { %189 = vmatprep.subr.bf16.mxu0 %v233_v4 }
  0x15   :  { %191 = vmatpush3.bf16.msra.mxu0 %v190_v18 }
  0x16   :  { %192 = vmatprep.subr.bf16.mxu0 %v233_v4 }
  0x19   :  { %194 = vmatpush3.bf16.msra.mxu0 %v193_v21 }
  0x1a   :  { %195 = vmatprep.subr.bf16.mxu0 %v233_v4 }
  0x1d   :  { %197 = vmatpush3.bf16.msra.mxu0 %v196_v24 }
  0x1e   :  { %198 = vmatprep.subr.bf16.mxu0 %v233_v4 }
  0x21   :  { %200 = vmatpush3.bf16.msra.mxu0 %v199_v27 }
  0x81   :  { %v17_v30 = vpop.permute.xlu0 %16 }
  0x82   :  { %vm18_vm1 = vcmp.eq.s32.totalorder %v13_v29, %v17_v30 }
  0x83   :  { %175 = vmatmul.mubr.msk.f32.vlgmr.msra.gmra.mrb[0].mxu0 %vm18_vm1, %v236_v31 }
 0x156   :  { %v103_v32 = vpop.f32.mrb[0].mxu0 }
 0x157   :  { %108 = vst.msk [vmem:[#allocation2] sm:$0x7] %vm107_vm2, %v103_v32  ;;  %v176_v33 = vpop.f32.mrb[1].mxu0 }
 0x158   :  { %219 = shalt.err (!%p216_p4)
}
 0x159   :  { %s220_s18 = scalar_lea.hbm %s318_s2, 64 }
 0x15a   :  { %p221_p5 = scmp.ne.s32.totalorder %s318_s2, %s220_s18  ;;  %p224_p6 = scmp.lt.u32.totalorder %s220_s18, %s318_s2 }
 0x15c   :  { %p226_p7 = pnand %p224_p6, %p221_p5 }
 0x15e   :  { %229 = shalt.err (!%p226_p7)
}
 0x15f   :  { %118 = dma.vmem_to_hbm [thread:$0]  %s116_s15, 64, %s318_s2, [#allocation3]  }
 0x160   :  { %230 = dma.done.wait [#allocation3], 64  }
 0x161   :  { %231 = vsyncadd [#allocation3], 4294967232 }
 0x162   :  { %122 = vsyncpa [#allocation3], 1 }

</bundles_post_ra>
